<compile_context>
chip_gen: v7x
topology: tpu7x:2x2x1
jax: 0.10.0
libtpu: 0.0.40
codegen_flags: <defaults>
</compile_context>

<pallas_src>
import functools

import jax
import jax.numpy as jnp
from jax import lax
from jax.experimental import pallas as pl
from jax.experimental.pallas import tpu as pltpu

EPS = 1e-5
MOMENTUM = 0.9


# ---------------------------------------------------------------------------
# Generation-aware VMEM budgets (v5e/v6e: 128 MiB, v7x: 64 MiB per core).
# ---------------------------------------------------------------------------
def _vmem_capacity_bytes():
    try:
        cap = getattr(pltpu.get_tpu_info(), "vmem_capacity_bytes", None)
        if cap:
            return int(cap)
    except Exception:
        pass
    return 64 * 1024 * 1024  # conservative (v7x-sized); safe on every generation


_VMEM_CAP = _vmem_capacity_bytes()
_VMEM_LIMIT = int(_VMEM_CAP * 0.90)     # explicit scoped-VMEM limit
_TILE_BUDGET = int(_VMEM_CAP * 0.60)    # double-buffered streaming working set
_FUSED_BUDGET = int(_VMEM_CAP * 0.35)   # whole-X-resident single-pass path


def _round_up(v, m):
    return ((v + m - 1) // m) * m


def _largest_tile(dim, align, cap):
    """Largest multiple of `align` that divides `dim` (dim % align == 0) and is
    <= cap (but at least `align`).  No full-dim fallback."""
    cap = max(align, min(cap, dim))
    best = align
    for t in range(align, cap + 1, align):
        if dim % t == 0:
            best = t
    return best


# ---------------------------------------------------------------------------
# Fused single-pass kernel (training): X fully VMEM-resident.
# Two-pass (centered) variance, then y = (x - mean) * scale + beta.
# ---------------------------------------------------------------------------
def bn_fused_train_kernel(x_ref, gamma_ref, beta_ref, y_ref, mean_ref, var_ref):
    x = x_ref[...].astype(jnp.float32)                       # (N, C, HW)
    n, _, hw = x.shape
    inv_m = 1.0 / float(n * hw)
    mean = jnp.sum(jnp.sum(x, axis=2, keepdims=True),
                   axis=0, keepdims=True) * inv_m            # (1, C, 1)
    xc = x - mean
    var = jnp.sum(jnp.sum(xc * xc, axis=2, keepdims=True),
                  axis=0, keepdims=True) * inv_m             # (1, C, 1)
    scale = gamma_ref[...] * lax.rsqrt(var + EPS)            # (1, C, 1)
    y_ref[...] = (xc * scale + beta_ref[...]).astype(y_ref.dtype)
    mean_ref[...] = mean
    var_ref[...] = var


# ---------------------------------------------------------------------------
# Pass 1 (streaming): per-row (row = one (n, c) pair) sum / sum-of-squares.
# Inner loop is VPU adds into lane-dense (row_tile, 128) scratch; the XLU
# cross-lane reduce happens once per row block at the last HW step.
# ---------------------------------------------------------------------------
def bn_sums_kernel(x_ref, sum_ref, sumsq_ref, sacc_ref, qacc_ref):
    j = pl.program_id(1)

    @pl.when(j == 0)
    def _():
        sacc_ref[...] = jnp.zeros_like(sacc_ref)
        qacc_ref[...] = jnp.zeros_like(qacc_ref)

    n_chunks = x_ref.shape[-1] // 128

    def body(c, carry):
        off = pl.multiple_of(c * 128, 128)
        chunk = x_ref[:, pl.ds(off, 128)].astype(jnp.float32)
        sacc_ref[...] += chunk
        qacc_ref[...] += chunk * chunk
        return carry

    lax.fori_loop(0, n_chunks, body, 0, unroll=min(n_chunks, 8))

    @pl.when(j == pl.num_programs(1) - 1)
    def _():
        sum_ref[...] = jnp.sum(sacc_ref[...], axis=-1, keepdims=True)
        sumsq_ref[...] = jnp.sum(qacc_ref[...], axis=-1, keepdims=True)


# ---------------------------------------------------------------------------
# Pass 2 (streaming): y = x * scale_row + shift_row (one FMA per element).
# scale/shift packed into a single (row_tile, 2) side input.
# ---------------------------------------------------------------------------
def bn_apply_kernel(x_ref, ss_ref, y_ref):
    x = x_ref[...].astype(jnp.float32)
    ss = ss_ref[...]
    y_ref[...] = (x * ss[:, 0:1] + ss[:, 1:2]).astype(y_ref.dtype)


@functools.partial(jax.jit,
                   static_argnames=("training", "allow_fused",
                                    "row_tile_cap", "hw_tile_cap"))
def batch_norm_pallas(x, gamma, beta, moving_mean, moving_var, *,
                      training=True, allow_fused=True,
                      row_tile_cap=None, hw_tile_cap=None):
    """Forward of the D2L custom BatchNorm for NCHW inputs.

    x: (N, C, H, W); gamma/beta/moving_mean/moving_var: (1, C, 1, 1).
    Returns (Y, new_moving_mean, new_moving_var).
    """
    # TODO(synk): num_dims == 2 (fully-connected (N, C) inputs) path not
    # implemented; this covers the 4-D conv layout used by the LeNet example.
    N, C, H, W = x.shape
    HW = H * W
    R = N * C
    M = N * HW
    itemsize = jnp.dtype(x.dtype).itemsize

    gamma_c = gamma.reshape(C).astype(jnp.float32)
    beta_c = beta.reshape(C).astype(jnp.float32)
    mm_c = moving_mean.reshape(C).astype(jnp.float32)
    mv_c = moving_var.reshape(C).astype(jnp.float32)

    # ----- fused single-pass path (X fits the per-generation VMEM budget) ----
    fused_est = R * HW * (4 * itemsize + 12)   # in/out (dbl-buffered) + f32 temps
    if training and allow_fused and fused_est <= _FUSED_BUDGET:
        x3 = x.reshape(N, C, HW)               # free view, full-dim blocks
        y3, mean3, var3 = pl.pallas_call(
            bn_fused_train_kernel,
            out_shape=(jax.ShapeDtypeStruct((N, C, HW), x.dtype),
                       jax.ShapeDtypeStruct((1, C, 1), jnp.float32),
                       jax.ShapeDtypeStruct((1, C, 1), jnp.float32)),
            grid_spec=pltpu.PrefetchScalarGridSpec(
                num_scalar_prefetch=0,
                grid=(1,),
                in_specs=[pl.BlockSpec((N, C, HW), lambda i: (0, 0, 0)),
                          pl.BlockSpec((1, C, 1), lambda i: (0, 0, 0)),
                          pl.BlockSpec((1, C, 1), lambda i: (0, 0, 0))],
                out_specs=(pl.BlockSpec((N, C, HW), lambda i: (0, 0, 0)),
                           pl.BlockSpec((1, C, 1), lambda i: (0, 0, 0)),
                           pl.BlockSpec((1, C, 1), lambda i: (0, 0, 0)))),
            compiler_params=pltpu.CompilerParams(
                dimension_semantics=("arbitrary",),
                vmem_limit_bytes=_VMEM_LIMIT),
        )(x3, gamma_c.reshape(1, C, 1), beta_c.reshape(1, C, 1))
        mean = mean3.reshape(C)
        var = var3.reshape(C)
        new_mm = MOMENTUM * mm_c + (1.0 - MOMENTUM) * mean
        new_mv = MOMENTUM * mv_c + (1.0 - MOMENTUM) * var
        return (y3.reshape(N, C, H, W),
                new_mm.reshape(1, C, 1, 1).astype(moving_mean.dtype),
                new_mv.reshape(1, C, 1, 1).astype(moving_var.dtype))

    # ----- streaming two-pass path (large activations) ------------------------
    row_align = 8 * max(1, 4 // itemsize)       # 8 f32 / 16 bf16 / 32 int8
    R_pad = _round_up(R, row_align)
    HW_pad = _round_up(HW, 128)

    x2 = x.reshape(R, HW)                       # free view of NCHW, no transpose
    if (R_pad, HW_pad) != (R, HW):
        # Zero-pad to aligned dims: zeros don't change sums; padding is sliced
        # off the output.  (One extra copy, never a VMEM-busting full-dim block.)
        x2 = jnp.pad(x2, ((0, R_pad - R), (0, HW_pad - HW)))

    # Tile selection: prefer hw_tile == HW_pad (contiguous per-row DMAs); size
    # the double-buffered pass-2 working set against the generation's budget.
    ws = 4 * itemsize + 8                       # ~bytes/elem of tile working set
    hw_cap = max(128, _TILE_BUDGET // (ws * row_align))
    if hw_tile_cap is not None:
        hw_cap = min(hw_cap, hw_tile_cap)
    if HW_pad <= hw_cap:
        hw_tile = HW_pad
    else:
        hw_tile = _largest_tile(HW_pad, 128, hw_cap)
    row_cap = max(row_align, _TILE_BUDGET // (ws * hw_tile))
    if row_tile_cap is not None:
        row_cap = min(row_cap, row_tile_cap)
    row_tile = _largest_tile(R_pad, row_align, row_cap)
    if R_pad // row_tile < 2 and R_pad >= 2 * row_align:
        # >=2 blocks on the parallel row axis so v7x megacore can split pass 1.
        row_tile = _largest_tile(R_pad, row_align, max(row_align, R_pad // 2))
    grid = (R_pad // row_tile, HW_pad // hw_tile)

    if training:
        row_sum, row_sumsq = pl.pallas_call(
            bn_sums_kernel,
            out_shape=(jax.ShapeDtypeStruct((R_pad, 1), jnp.float32),
                       jax.ShapeDtypeStruct((R_pad, 1), jnp.float32)),
            grid_spec=pltpu.PrefetchScalarGridSpec(
                num_scalar_prefetch=0,
                grid=grid,
                in_specs=[pl.BlockSpec((row_tile, hw_tile),
                                       lambda i, j: (i, j))],
                out_specs=(pl.BlockSpec((row_tile, 1), lambda i, j: (i, 0)),
                           pl.BlockSpec((row_tile, 1), lambda i, j: (i, 0))),
                scratch_shapes=[pltpu.VMEM((row_tile, 128), jnp.float32),
                                pltpu.VMEM((row_tile, 128), jnp.float32)]),
            compiler_params=pltpu.CompilerParams(
                dimension_semantics=("parallel", "arbitrary"),
                vmem_limit_bytes=_VMEM_LIMIT),
        )(x2)

        # Tiny O(N*C) finalize (rows are (n, c) in n-major order).
        ch_sum = row_sum[:R, 0].reshape(N, C).sum(axis=0)
        ch_sumsq = row_sumsq[:R, 0].reshape(N, C).sum(axis=0)
        mean = ch_sum / M
        var = jnp.maximum(ch_sumsq / M - mean * mean, 0.0)   # one-pass, f32 acc
        new_mm = MOMENTUM * mm_c + (1.0 - MOMENTUM) * mean
        new_mv = MOMENTUM * mv_c + (1.0 - MOMENTUM) * var
    else:
        mean, var = mm_c, mv_c
        new_mm, new_mv = mm_c, mv_c

    inv_std = lax.rsqrt(var + EPS)
    scale_c = gamma_c * inv_std
    shift_c = beta_c - mean * scale_c
    # Packed per-row (scale, shift): row n*C + c gets channel c.
    ss = jnp.stack([jnp.tile(scale_c, N), jnp.tile(shift_c, N)], axis=-1)
    if R_pad != R:
        ss = jnp.pad(ss, ((0, R_pad - R), (0, 0)))

    y2 = pl.pallas_call(
        bn_apply_kernel,
        out_shape=jax.ShapeDtypeStruct((R_pad, HW_pad), x.dtype),
        grid_spec=pltpu.PrefetchScalarGridSpec(
            num_scalar_prefetch=0,
            grid=grid,
            in_specs=[pl.BlockSpec((row_tile, hw_tile), lambda i, j: (i, j)),
                      pl.BlockSpec((row_tile, 2), lambda i, j: (i, 0))],
            out_specs=pl.BlockSpec((row_tile, hw_tile), lambda i, j: (i, j))),
        compiler_params=pltpu.CompilerParams(
            dimension_semantics=("parallel", "parallel"),
            vmem_limit_bytes=_VMEM_LIMIT),
    )(x2, ss)

    if (R_pad, HW_pad) != (R, HW):
        y2 = y2[:R, :HW]
    y = y2.reshape(N, C, H, W)
    return (y,
            new_mm.reshape(1, C, 1, 1).astype(moving_mean.dtype),
            new_mv.reshape(1, C, 1, 1).astype(moving_var.dtype))


# ---------------------------------------------------------------------------
# Pure-JAX references (training and eval branches of the D2L batch_norm).
# ---------------------------------------------------------------------------
def _reference_train(x, gamma, beta, moving_mean, moving_var):
    mean = x.mean(axis=(0, 2, 3), keepdims=True)
    var = ((x - mean) ** 2).mean(axis=(0, 2, 3), keepdims=True)
    x_hat = (x - mean) / jnp.sqrt(var + EPS)
    y = gamma * x_hat + beta
    new_mm = MOMENTUM * moving_mean + (1.0 - MOMENTUM) * mean
    new_mv = MOMENTUM * moving_var + (1.0 - MOMENTUM) * var
    return y, new_mm, new_mv


def _reference_eval(x, gamma, beta, moving_mean, moving_var):
    x_hat = (x - moving_mean) / jnp.sqrt(moving_var + EPS)
    return gamma * x_hat + beta


if __name__ == "__main__":
    key = jax.random.PRNGKey(0)
    k1, k2, k3 = jax.random.split(key, 3)

    def init_params(C):
        return (jnp.ones((1, C, 1, 1), jnp.float32),
                jnp.zeros((1, C, 1, 1), jnp.float32),
                jnp.zeros((1, C, 1, 1), jnp.float32),
                jnp.zeros((1, C, 1, 1), jnp.float32))

    # --- 1) small LeNet-like shape -> fused single-pass path ---
    N, C, H, W = 2, 4, 16, 16
    x = jax.random.normal(k1, (N, C, H, W), jnp.float32)
    gamma, beta, mm, mv = init_params(C)

    y, new_mm, new_mv = batch_norm_pallas(x, gamma, beta, mm, mv)
    jax.block_until_ready((y, new_mm, new_mv))
    y_ref, mm_ref, mv_ref = _reference_train(x, gamma, beta, mm, mv)
    assert jnp.allclose(y, y_ref, atol=1e-4, rtol=1e-4)
    assert jnp.allclose(new_mm, mm_ref, atol=1e-5, rtol=1e-4)
    assert jnp.allclose(new_mv, mv_ref, atol=1e-5, rtol=1e-4)

    # eval-mode path with the updated running stats (single-FMA apply pass)
    y_eval, _, _ = batch_norm_pallas(x, gamma, beta, new_mm, new_mv,
                                     training=False)
    y_eval_ref = _reference_eval(x, gamma, beta, new_mm, new_mv)
    assert jnp.allclose(y_eval, y_eval_ref, atol=1e-4, rtol=1e-4)

    # --- 2) force the streaming 2-pass path with a multi-block grid
    #        (2 row blocks x 4 hw blocks: accumulation across the hw axis) ---
    N2, C2, H2, W2 = 4, 32, 32, 32
    x_big = jax.random.normal(k2, (N2, C2, H2, W2), jnp.float32)
    g2, b2, mm2, mv2 = init_params(C2)
    y2, nmm2, nmv2 = batch_norm_pallas(x_big, g2, b2, mm2, mv2,
                                       allow_fused=False,
                                       row_tile_cap=64, hw_tile_cap=256)
    jax.block_until_ready((y2, nmm2, nmv2))
    y2_ref, mm2_ref, mv2_ref = _reference_train(x_big, g2, b2, mm2, mv2)
    assert jnp.allclose(y2, y2_ref, atol=1e-4, rtol=1e-4)
    assert jnp.allclose(nmm2, mm2_ref, atol=1e-5, rtol=1e-4)
    assert jnp.allclose(nmv2, mv2_ref, atol=1e-5, rtol=1e-4)

    # --- 3) streaming path with non-(8,128)-aligned dims -> exercises padding ---
    N3, C3, H3, W3 = 2, 3, 10, 10
    x_odd = jax.random.normal(k3, (N3, C3, H3, W3), jnp.float32)
    g3, b3, mm3, mv3 = init_params(C3)
    y3, nmm3, nmv3 = batch_norm_pallas(x_odd, g3, b3, mm3, mv3,
                                       allow_fused=False)
    jax.block_until_ready((y3, nmm3, nmv3))
    y3_ref, mm3_ref, mv3_ref = _reference_train(x_odd, g3, b3, mm3, mv3)
    assert jnp.allclose(y3, y3_ref, atol=1e-4, rtol=1e-4)
    assert jnp.allclose(nmm3, mm3_ref, atol=1e-5, rtol=1e-4)
    assert jnp.allclose(nmv3, mv3_ref, atol=1e-5, rtol=1e-4)

    print("KERNEL_OK")
</pallas_src>

<mosaic_0001>
module attributes {stable_mosaic.version = 11 : i64} {
  func.func @bn_fused_train_kernel(%arg0: i32, %arg1: memref<2x4x256xf32, #tpu.memory_space<vmem>>, %arg2: memref<1x4x1xf32, #tpu.memory_space<vmem>>, %arg3: memref<1x4x1xf32, #tpu.memory_space<vmem>>, %arg4: memref<2x4x256xf32, #tpu.memory_space<vmem>>, %arg5: memref<1x4x1xf32, #tpu.memory_space<vmem>>, %arg6: memref<1x4x1xf32, #tpu.memory_space<vmem>>) attributes {dimension_semantics = [#tpu.dimension_semantics<arbitrary>], iteration_bounds = array<i64: 1>, scalar_prefetch = 0 : i64, scratch_operands = 0 : i64, tpu.core_type = #tpu.core_type<tc>, window_params = [{pipeline_mode = #tpu.pipeline_mode<synchronous>, transform_indices = @transform_0, window_bounds = array<i64: 2, 4, 256>}, {pipeline_mode = #tpu.pipeline_mode<synchronous>, transform_indices = @transform_1, window_bounds = array<i64: 1, 4, 1>}, {pipeline_mode = #tpu.pipeline_mode<synchronous>, transform_indices = @transform_2, window_bounds = array<i64: 1, 4, 1>}, {pipeline_mode = #tpu.pipeline_mode<synchronous>, transform_indices = @transform_3, window_bounds = array<i64: 2, 4, 256>}, {pipeline_mode = #tpu.pipeline_mode<synchronous>, transform_indices = @transform_4, window_bounds = array<i64: 1, 4, 1>}, {pipeline_mode = #tpu.pipeline_mode<synchronous>, transform_indices = @transform_5, window_bounds = array<i64: 1, 4, 1>}]} {
    %c0 = arith.constant 0 : index
    %c0_0 = arith.constant 0 : index
    %c0_1 = arith.constant 0 : index
    %0 = vector.load %arg1[%c0, %c0_0, %c0_1] : memref<2x4x256xf32, #tpu.memory_space<vmem>>, vector<2x4x256xf32>
    %cst = arith.constant dense<0.000000e+00> : vector<2x4xf32>
    %1 = vector.multi_reduction <add>, %0, %cst [2] : vector<2x4x256xf32> to vector<2x4xf32>
    %2 = vector.shape_cast %1 : vector<2x4xf32> to vector<2x4x1xf32>
    %cst_2 = arith.constant dense<0.000000e+00> : vector<4x1xf32>
    %3 = vector.multi_reduction <add>, %2, %cst_2 [0] : vector<2x4x1xf32> to vector<4x1xf32>
    %4 = vector.shape_cast %3 : vector<4x1xf32> to vector<1x4x1xf32>
    %cst_3 = arith.constant 0.001953125 : f32
    %5 = vector.broadcast %cst_3 : f32 to vector<1x4x1xf32>
    %6 = arith.mulf %4, %5 : vector<1x4x1xf32>
    %7 = vector.broadcast %6 : vector<1x4x1xf32> to vector<2x4x256xf32>
    %8 = arith.subf %0, %7 : vector<2x4x256xf32>
    %9 = arith.mulf %8, %8 : vector<2x4x256xf32>
    %cst_4 = arith.constant dense<0.000000e+00> : vector<2x4xf32>
    %10 = vector.multi_reduction <add>, %9, %cst_4 [2] : vector<2x4x256xf32> to vector<2x4xf32>
    %11 = vector.shape_cast %10 : vector<2x4xf32> to vector<2x4x1xf32>
    %cst_5 = arith.constant dense<0.000000e+00> : vector<4x1xf32>
    %12 = vector.multi_reduction <add>, %11, %cst_5 [0] : vector<2x4x1xf32> to vector<4x1xf32>
    %13 = vector.shape_cast %12 : vector<4x1xf32> to vector<1x4x1xf32>
    %cst_6 = arith.constant 0.001953125 : f32
    %14 = vector.broadcast %cst_6 : f32 to vector<1x4x1xf32>
    %15 = arith.mulf %13, %14 : vector<1x4x1xf32>
    %c0_7 = arith.constant 0 : index
    %c0_8 = arith.constant 0 : index
    %c0_9 = arith.constant 0 : index
    %16 = vector.load %arg2[%c0_7, %c0_8, %c0_9] : memref<1x4x1xf32, #tpu.memory_space<vmem>>, vector<1x4x1xf32>
    %cst_10 = arith.constant 9.99999974E-6 : f32
    %17 = vector.broadcast %cst_10 : f32 to vector<1x4x1xf32>
    %18 = arith.addf %15, %17 : vector<1x4x1xf32>
    %19 = math.rsqrt %18 : vector<1x4x1xf32>
    %20 = arith.mulf %16, %19 : vector<1x4x1xf32>
    %21 = vector.broadcast %20 : vector<1x4x1xf32> to vector<2x4x256xf32>
    %22 = arith.mulf %8, %21 : vector<2x4x256xf32>
    %c0_11 = arith.constant 0 : index
    %c0_12 = arith.constant 0 : index
    %c0_13 = arith.constant 0 : index
    %23 = vector.load %arg3[%c0_11, %c0_12, %c0_13] : memref<1x4x1xf32, #tpu.memory_space<vmem>>, vector<1x4x1xf32>
    %24 = vector.broadcast %23 : vector<1x4x1xf32> to vector<2x4x256xf32>
    %25 = arith.addf %22, %24 : vector<2x4x256xf32>
    %c0_14 = arith.constant 0 : index
    %c0_15 = arith.constant 0 : index
    %c0_16 = arith.constant 0 : index
    %26 = vector.load %arg4[%c0_14, %c0_15, %c0_16] : memref<2x4x256xf32, #tpu.memory_space<vmem>>, vector<2x4x256xf32>
    tpu.vector_store %arg4[%c0_14, %c0_15, %c0_16], %25 {strides = array<i32>} : memref<2x4x256xf32, #tpu.memory_space<vmem>>, vector<2x4x256xf32>,
    %c0_17 = arith.constant 0 : index
    %c0_18 = arith.constant 0 : index
    %c0_19 = arith.constant 0 : index
    %27 = vector.load %arg5[%c0_17, %c0_18, %c0_19] : memref<1x4x1xf32, #tpu.memory_space<vmem>>, vector<1x4x1xf32>
    tpu.vector_store %arg5[%c0_17, %c0_18, %c0_19], %6 {strides = array<i32>} : memref<1x4x1xf32, #tpu.memory_space<vmem>>, vector<1x4x1xf32>,
    %c0_20 = arith.constant 0 : index
    %c0_21 = arith.constant 0 : index
    %c0_22 = arith.constant 0 : index
    %28 = vector.load %arg6[%c0_20, %c0_21, %c0_22] : memref<1x4x1xf32, #tpu.memory_space<vmem>>, vector<1x4x1xf32>
    tpu.vector_store %arg6[%c0_20, %c0_21, %c0_22], %15 {strides = array<i32>} : memref<1x4x1xf32, #tpu.memory_space<vmem>>, vector<1x4x1xf32>,
    return
  }
  func.func @transform_0(%arg0: i32) -> (i32, i32, i32) {
    %c0_i32 = arith.constant 0 : i32
    %c0_i32_0 = arith.constant 0 : i32
    %c0_i32_1 = arith.constant 0 : i32
    %c0_i32_2 = arith.constant 0 : i32
    return %c0_i32, %c0_i32_0, %c0_i32_1 : i32, i32, i32
  }
  func.func @transform_1(%arg0: i32) -> (i32, i32, i32) {
    %c0_i32 = arith.constant 0 : i32
    %c0_i32_0 = arith.constant 0 : i32
    %c0_i32_1 = arith.constant 0 : i32
    %c0_i32_2 = arith.constant 0 : i32
    return %c0_i32, %c0_i32_0, %c0_i32_1 : i32, i32, i32
  }
  func.func @transform_2(%arg0: i32) -> (i32, i32, i32) {
    %c0_i32 = arith.constant 0 : i32
    %c0_i32_0 = arith.constant 0 : i32
    %c0_i32_1 = arith.constant 0 : i32
    %c0_i32_2 = arith.constant 0 : i32
    return %c0_i32, %c0_i32_0, %c0_i32_1 : i32, i32, i32
  }
  func.func @transform_3(%arg0: i32) -> (i32, i32, i32) {
    %c0_i32 = arith.constant 0 : i32
    %c0_i32_0 = arith.constant 0 : i32
    %c0_i32_1 = arith.constant 0 : i32
    %c0_i32_2 = arith.constant 0 : i32
    return %c0_i32, %c0_i32_0, %c0_i32_1 : i32, i32, i32
  }
  func.func @transform_4(%arg0: i32) -> (i32, i32, i32) {
    %c0_i32 = arith.constant 0 : i32
    %c0_i32_0 = arith.constant 0 : i32
    %c0_i32_1 = arith.constant 0 : i32
    %c0_i32_2 = arith.constant 0 : i32
    return %c0_i32, %c0_i32_0, %c0_i32_1 : i32, i32, i32
  }
  func.func @transform_5(%arg0: i32) -> (i32, i32, i32) {
    %c0_i32 = arith.constant 0 : i32
    %c0_i32_0 = arith.constant 0 : i32
    %c0_i32_1 = arith.constant 0 : i32
    %c0_i32_2 = arith.constant 0 : i32
    return %c0_i32, %c0_i32_0, %c0_i32_1 : i32, i32, i32
  }
}

</mosaic_0001>

<bundles_post_ra>
// kernel: batch_norm_pallas.1
= control target key start
LH: loop header
LB: loop body
LE: loop exit
PB: predicated region body
PF: predicated region fallthrough
CT: control target
= control target key end

     0   :  { %vm25_vm0 = vcmask 1043456   ;;  %v131_v10 = vmov 839922192   ;;  %v44_v12 = vlaneseq  ;;  %vm108_vm1 = vcmask 3072   ;;  %s201_s0 = inlined_call_operand.vmem [shape: f32[2,4,256], index: 0, kind: input, shape index: {}]   ;;  %s202_s4 = inlined_call_operand.vmem [shape: f32[1,4,1], index: 4, kind: output, shape index: {1}]   ;;  %s203_s2 = inlined_call_operand.vmem [shape: f32[1,4,1], index: 2, kind: input, shape index: {}]   ;;  %s204_s5 = inlined_call_operand.vmem [shape: f32[1,4,1], index: 5, kind: output, shape index: {2}]   ;;  %s205_s1 = inlined_call_operand.vmem [shape: f32[1,4,1], index: 1, kind: input, shape index: {}]   ;;  %s206_s3 = inlined_call_operand.vmem [shape: f32[2,4,256], index: 3, kind: output, shape index: {0}]  }
   0x1   :  { %v17_v0 = vld [vmem:[%s201_s0] sm:$0xff]  ;;  %v18_v1 = vld [vmem:[%s201_s0 + $0x8] sm:$0xff]  ;;  %v42_v11 = vunpack.c.l.s4 %v131_v10  ;;  %v132_v35 = vmov 0  }
   0x2   :  { %v21_v2 = vcombine.high %v17_v0, %v17_v0  ;;  %v26_v3 = vsel %vm25_vm0, %v17_v0, 0.0  ;;  %v22_v4 = vcombine.high %v18_v1, %v18_v1  ;;  %v31_v6 = vsel %vm25_vm0, %v18_v1, 0.0  ;;  %125 = vset.pattern.permute.xlu0 %v132_v35  ;;  %126 = vset.pattern.permute.xlu1 %v132_v35  ;;  %v91_v36 = vld [vmem:[%s203_s2] sm:$0xf] }
   0x3   :  { %v43_v14 = vunpack.c.0.s8 %v42_v11  ;;  %v45_v15 = vshrl.u32 %v44_v12, 7  ;;  %v73_v44 = vld [vmem:[%s205_s1] sm:$0xf] }
   0x4   :  { %v27_v5 = vsel %vm25_vm0, %v21_v2, 0.0  ;;  %v32_v7 = vsel %vm25_vm0, %v22_v4, 0.0 }
   0x5   :  { %v28_v8 = vadd.f32 %v27_v5, %v26_v3  ;;  %v33_v9 = vadd.f32 %v32_v7, %v31_v6  ;;  %v46_v19 = vsub.s32 %v43_v14, %v45_v15 }
   0x7   :  { %29 = vadd.xlane.f32.xlu0 %v28_v8 }
   0xb   :  { %34 = vadd.xlane.f32.xlu0 %v33_v9 }
  0x94   :  { %v30_v13 = vpop.xlane.xlu0 %29 }
  0x95   :  { %v36_v17 = vsel %vm25_vm0, %v30_v13, 0.0 }
  0x98   :  { %v35_v16 = vpop.xlane.xlu0 %34 }
  0x99   :  { %v37_v18 = vsel %vm25_vm0, %v35_v16, 0.0 }
  0x9a   :  { %v38_v20 = vadd.f32 %v37_v18, %v36_v17 }
  0x9c   :  { %v39_v21 = vmul.f32 0.001953125, %v38_v20 }
  0x9e   :  { %v47_v22 = vrot.slane %v39_v21, %v46_v19  ;;  %109 = vst.msk [vmem:[%s202_s4] sm:$0xf] %vm108_vm1, %v39_v21 }
  0xa0   :  { %v50_v23 = vsub.f32 %v18_v1, %v47_v22  ;;  %v49_v24 = vsub.f32 %v17_v0, %v47_v22 }
  0xa2   :  { %v51_v25 = vmul.f32 %v49_v24, %v49_v24  ;;  %v52_v26 = vmul.f32 %v50_v23, %v50_v23 }
  0xa4   :  { %v55_v27 = vcombine.high %v51_v25, %v51_v25  ;;  %v56_v28 = vcombine.high %v52_v26, %v52_v26  ;;  %v59_v29 = vsel %vm25_vm0, %v51_v25, 0.0  ;;  %v64_v33 = vsel %vm25_vm0, %v52_v26, 0.0 }
  0xa6   :  { %v60_v30 = vsel %vm25_vm0, %v55_v27, 0.0  ;;  %v65_v32 = vsel %vm25_vm0, %v56_v28, 0.0 }
  0xa7   :  { %v61_v31 = vadd.f32 %v60_v30, %v59_v29  ;;  %v66_v34 = vadd.f32 %v65_v32, %v64_v33 }
  0xa9   :  { %62 = vadd.xlane.f32.xlu1 %v61_v31 }
  0xad   :  { %67 = vadd.xlane.f32.xlu1 %v66_v34 }
  0xbe   :  { %94 = vperm.xlu1 %126, %v91_v36  }
 0x136   :  { %v63_v37 = vpop.xlane.xlu1 %62 }
 0x137   :  { %v69_v39 = vsel %vm25_vm0, %v63_v37, 0.0 }
 0x13a   :  { %v68_v38 = vpop.xlane.xlu1 %67 }
 0x13b   :  { %v70_v40 = vsel %vm25_vm0, %v68_v38, 0.0 }
 0x13c   :  { %v71_v41 = vadd.f32 %v70_v40, %v69_v39 }
 0x13e   :  { %v72_v42 = vmul.f32 0.001953125, %v71_v41  ;;  %v95_v47 = vpop.permute.xlu1 %94 }
 0x13f   :  { %v102_v50 = vrot.slane %v95_v47, %v46_v19 }
 0x140   :  { %v74_v43 = vadd.f32 1e-05, %v72_v42  ;;  %110 = vst.msk [vmem:[%s204_s5] sm:$0xf] %vm108_vm1, %v72_v42 }
 0x142   :  { %129 = vrsqrt.f32 %v74_v43 }
 0x14c   :  { %v130_v45 = vpop.eup %129 }
 0x14d   :  { %v76_v46 = vmul.f32 %v130_v45, %v73_v44 }
 0x14f   :  { %79 = vperm.xlu0 %125, %v76_v46  }
 0x1ce   :  { %v80_v48 = vpop.permute.xlu0 %79 }
 0x1cf   :  { %v87_v49 = vrot.slane %v80_v48, %v46_v19 }
 0x1d1   :  { %v89_v51 = vmul.f32 %v87_v49, %v49_v24  ;;  %v90_v52 = vmul.f32 %v87_v49, %v50_v23 }
 0x1d3   :  { %v104_v53 = vadd.f32 %v102_v50, %v89_v51  ;;  %v105_v54 = vadd.f32 %v102_v50, %v90_v52 }
 0x1d5   :  { %106 = vst [vmem:[%s206_s3] sm:$0xff] %v104_v53  ;;  %107 = vst [vmem:[%s206_s3 + $0x8] sm:$0xff] %v105_v54 }

</bundles_post_ra>
